<compile_context>
chip_gen: v6e
topology: v6e:2x2x1
jax: 0.10.0
libtpu: 0.0.40
codegen_flags: <defaults>
</compile_context>

<pallas_src>
import jax
import jax.numpy as jnp
from jax.experimental import pallas as pl
from jax.experimental.pallas import tpu as pltpu


def lstm_wave_kernel(x_ref, w_ref, wfc_ref, bfc_ref, out_ref):
    # x_ref  : (B, T)       input series (input_size == 1, squeezed)
    # w_ref  : (2H+2, 8H)   fused block-diagonal wave weights (see prepare_params)
    # wfc_ref: (1, H)       fc weight row
    # bfc_ref: (1, 1)       fc bias
    # out_ref: (B, 1)
    B, T = x_ref.shape
    H = wfc_ref.shape[1]

    W = w_ref[...]                                  # read once; VMEM/vreg resident
    ones = jnp.ones((B, 1), jnp.float32)
    zcol = jnp.zeros((B, 1), jnp.float32)
    zH = jnp.zeros((B, H), jnp.float32)

    h = jnp.zeros((B, 2 * H), jnp.float32)          # [h0 | h1]
    c = jnp.zeros((B, 2 * H), jnp.float32)          # [c0 | c1]

    # Wave pipeline, fully unrolled (T static & tiny). Wave t runs layer-0 step t and
    # layer-1 step t-1 through ONE fused MXU pass: both depend only on the state
    # produced by wave t-1. Wave 0 = layer-0 prologue (layer-1 half masked back to its
    # zero init); wave T = layer-1 epilogue (layer-0 half computed with x=0, discarded).
    for t in range(T + 1):
        xcol = x_ref[:, t:t + 1] if t < T else zcol
        lhs = jnp.concatenate([h, xcol, ones], axis=-1)                  # (B, 2H+2)
        gates = jnp.dot(lhs, W, preferred_element_type=jnp.float32)      # (B, 8H)
        # sigmoid over the contiguous [i0 i1 f0 f1 o0 o1] prefix, tanh over [g0 g1]
        sig = jax.nn.sigmoid(gates[:, : 6 * H])                          # (B, 6H)
        g = jnp.tanh(gates[:, 6 * H:])                                   # (B, 2H)
        i = sig[:, 0: 2 * H]
        f = sig[:, 2 * H: 4 * H]
        o = sig[:, 4 * H: 6 * H]
        c_new = f * c + i * g                                            # both layers at once
        h_new = o * jnp.tanh(c_new)
        if t == 0:
            # prologue: only the layer-0 half is real; keep layer-1 state at zero
            h = jnp.concatenate([h_new[:, :H], zH], axis=-1)
            c = jnp.concatenate([c_new[:, :H], zH], axis=-1)
        else:
            h, c = h_new, c_new

    # fc on h1[T-1] (top-layer last hidden state): VPU mul + lane reduce, no MXU pass.
    h1 = h[:, H: 2 * H]
    out_ref[...] = jnp.sum(h1 * wfc_ref[...], axis=-1, keepdims=True) + bfc_ref[...]


def prepare_params(params):
    """One-time param prep: build the fused block-diagonal wave weight matrix.

    W rows (multiplied by lhs = [h0 | h1 | x_t | 1]):
      rows 0:H    <- h0   (layer-0 recurrent weights  + layer-1 input weights)
      rows H:2H   <- h1   (layer-1 recurrent weights)
      row  2H     <- x_t  (layer-0 input weights; input_size == 1)
      row  2H+1   <- 1    (both layers' combined biases)
    W columns ordered [i0 i1 | f0 f1 | o0 o1 | g0 g1] so the kernel applies sigmoid to one
    contiguous 6H prefix, tanh to the trailing 2H block, and slices i/f/o/g as contiguous
    2H chunks covering both layers.
    """
    H = params["whh0"].shape[1]
    f32 = jnp.float32

    def gates(w_t):  # split last axis (4H, torch order [i, f, g, o])
        return (w_t[..., 0:H], w_t[..., H:2 * H], w_t[..., 2 * H:3 * H], w_t[..., 3 * H:4 * H])

    i0h, f0h, g0h, o0h = gates(params["whh0"].T)                        # h0 -> layer-0
    i1h, f1h, g1h, o1h = gates(params["wih1"].T)                        # h0 -> layer-1
    i1r, f1r, g1r, o1r = gates(params["whh1"].T)                        # h1 -> layer-1
    i0x, f0x, g0x, o0x = gates(params["wih0"].T)                        # x_t -> layer-0
    i0b, f0b, g0b, o0b = gates((params["bih0"] + params["bhh0"])[None, :])
    i1b, f1b, g1b, o1b = gates((params["bih1"] + params["bhh1"])[None, :])

    zH = jnp.zeros((H, H), f32)
    z1 = jnp.zeros((1, H), f32)

    def row(i0, i1, f0, f1, o0, o1, g0, g1):
        return jnp.concatenate([i0, i1, f0, f1, o0, o1, g0, g1], axis=-1)

    W = jnp.concatenate([
        row(i0h, i1h, f0h, f1h, o0h, o1h, g0h, g1h),    # (H, 8H)  <- h0
        row(zH,  i1r, zH,  f1r, zH,  o1r, zH,  g1r),    # (H, 8H)  <- h1
        row(i0x, z1,  f0x, z1,  o0x, z1,  g0x, z1),     # (1, 8H)  <- x_t
        row(i0b, i1b, f0b, f1b, o0b, o1b, g0b, g1b),    # (1, 8H)  <- 1 (bias)
    ], axis=0).astype(f32)                              # (2H+2, 8H)

    return {"W": W,
            "wfc": params["wfc"].astype(f32),           # (1, H)
            "bfc": params["bfc"][None, :].astype(f32)}  # (1, 1)


@jax.jit
def lstm_forward(x, W, wfc, bfc):
    """x: (B, T, 1) float32.  Returns (B, 1) float32."""
    B, T, _ = x.shape
    x2d = x[..., 0]                                     # (B, T)
    vmem = pl.BlockSpec(memory_space=pltpu.MemorySpace.VMEM)
    return pl.pallas_call(
        lstm_wave_kernel,
        out_shape=jax.ShapeDtypeStruct((B, 1), jnp.float32),
        in_specs=[vmem, vmem, vmem, vmem],
        out_specs=vmem,
    )(x2d, W, wfc, bfc)


def lstm_reference(x, params):
    """Pure-JAX reference matching torch.nn.LSTM(batch_first) + Linear (eval mode)."""
    B, T, _ = x.shape
    H = params["whh0"].shape[1]

    def cell(gates, c):
        i = jax.nn.sigmoid(gates[:, 0 * H:1 * H])
        f = jax.nn.sigmoid(gates[:, 1 * H:2 * H])
        g = jnp.tanh(gates[:, 2 * H:3 * H])
        o = jax.nn.sigmoid(gates[:, 3 * H:4 * H])
        c_new = f * c + i * g
        return o * jnp.tanh(c_new), c_new

    h0 = c0 = h1 = c1 = jnp.zeros((B, H), jnp.float32)
    for t in range(T):
        xt = x[:, t, :]  # (B, 1)
        g0 = xt @ params["wih0"].T + params["bih0"] + h0 @ params["whh0"].T + params["bhh0"]
        h0, c0 = cell(g0, c0)
        g1 = h0 @ params["wih1"].T + params["bih1"] + h1 @ params["whh1"].T + params["bhh1"]
        h1, c1 = cell(g1, c1)
    return h1 @ params["wfc"].T + params["bfc"]


def init_params(key, input_size=1, hidden_size=32):
    """Deterministic init, PyTorch-style uniform(-1/sqrt(H), 1/sqrt(H))."""
    H = hidden_size
    k = 1.0 / jnp.sqrt(jnp.float32(H))
    names_shapes = [
        ("wih0", (4 * H, input_size)), ("whh0", (4 * H, H)),
        ("bih0", (4 * H,)), ("bhh0", (4 * H,)),
        ("wih1", (4 * H, H)), ("whh1", (4 * H, H)),
        ("bih1", (4 * H,)), ("bhh1", (4 * H,)),
        ("wfc", (1, H)), ("bfc", (1,)),
    ]
    keys = jax.random.split(key, len(names_shapes))
    return {name: jax.random.uniform(kk, shape, jnp.float32, -k, k)
            for kk, (name, shape) in zip(keys, names_shapes)}


if __name__ == "__main__":
    B, T, INPUT, H = 2, 8, 1, 32

    root = jax.random.PRNGKey(0)
    kx, kp = jax.random.split(root)
    x = jax.random.normal(kx, (B, T, INPUT), jnp.float32)
    params = init_params(kp, input_size=INPUT, hidden_size=H)

    prepped = prepare_params(params)        # one-time: fused weights, no per-call glue
    out = jax.block_until_ready(
        lstm_forward(x, prepped["W"], prepped["wfc"], prepped["bfc"]))
    ref = lstm_reference(x, params)

    assert out.shape == (B, 1), out.shape
    assert jnp.allclose(out, ref, atol=1e-5, rtol=1e-5), (out, ref)
    print("KERNEL_OK")
</pallas_src>

<mosaic_0001>
module attributes {stable_mosaic.version = 11 : i64} {
  func.func @lstm_wave_kernel(%arg0: memref<2x8xf32, #tpu.memory_space<vmem>>, %arg1: memref<66x256xf32, #tpu.memory_space<vmem>>, %arg2: memref<1x32xf32, #tpu.memory_space<vmem>>, %arg3: memref<1x1xf32, #tpu.memory_space<vmem>>, %arg4: memref<2x1xf32, #tpu.memory_space<vmem>>) attributes {dimension_semantics = [], scalar_prefetch = 0 : i64, scratch_operands = 0 : i64, tpu.core_type = #tpu.core_type<tc>} {
    %c0 = arith.constant 0 : index
    %c0_0 = arith.constant 0 : index
    %0 = vector.load %arg1[%c0, %c0_0] : memref<66x256xf32, #tpu.memory_space<vmem>>, vector<66x256xf32>
    %cst = arith.constant 1.000000e+00 : f32
    %1 = vector.broadcast %cst : f32 to vector<2x1xf32>
    %cst_1 = arith.constant 0.000000e+00 : f32
    %2 = vector.broadcast %cst_1 : f32 to vector<2x1xf32>
    %cst_2 = arith.constant 0.000000e+00 : f32
    %3 = vector.broadcast %cst_2 : f32 to vector<2x32xf32>
    %cst_3 = arith.constant 0.000000e+00 : f32
    %4 = vector.broadcast %cst_3 : f32 to vector<2x64xf32>
    %cst_4 = arith.constant 0.000000e+00 : f32
    %5 = vector.broadcast %cst_4 : f32 to vector<2x64xf32>
    %c0_5 = arith.constant 0 : index
    %c0_6 = arith.constant 0 : index
    %6 = vector.load %arg0[%c0_5, %c0_6] : memref<2x8xf32, #tpu.memory_space<vmem>>, vector<2x1xf32>
    %7 = tpu.concatenate %4, %6, %1 in 1 : vector<2x64xf32>, vector<2x1xf32>, vector<2x1xf32> -> vector<2x66xf32>
    %cst_7 = arith.constant dense<0.000000e+00> : vector<2x256xf32>
    %8 = tpu.matmul %7, %0, %cst_7 {dimension_numbers = #tpu.dot_dimension_numbers<[1], [0], [0], [1], [0, 0, 1, 1], [], []>} : vector<2x66xf32>, vector<66x256xf32>, vector<2x256xf32> -> vector<2x256xf32>
    %9 = vector.extract_strided_slice %8 {offsets = [0, 0], sizes = [2, 192], strides = [1, 1]} : vector<2x256xf32> to vector<2x192xf32>
    %10 = arith.negf %9 : vector<2x192xf32>
    %11 = math.exp %10 : vector<2x192xf32>
    %cst_8 = arith.constant 1.000000e+00 : f32
    %12 = vector.broadcast %cst_8 : f32 to vector<2x192xf32>
    %13 = arith.addf %12, %11 : vector<2x192xf32>
    %14 = arith.divf %12, %13 : vector<2x192xf32>
    %15 = vector.extract_strided_slice %8 {offsets = [0, 192], sizes = [2, 64], strides = [1, 1]} : vector<2x256xf32> to vector<2x64xf32>
    %16 = math.tanh %15 : vector<2x64xf32>
    %17 = vector.extract_strided_slice %14 {offsets = [0, 0], sizes = [2, 64], strides = [1, 1]} : vector<2x192xf32> to vector<2x64xf32>
    %18 = vector.extract_strided_slice %14 {offsets = [0, 64], sizes = [2, 64], strides = [1, 1]} : vector<2x192xf32> to vector<2x64xf32>
    %19 = vector.extract_strided_slice %14 {offsets = [0, 128], sizes = [2, 64], strides = [1, 1]} : vector<2x192xf32> to vector<2x64xf32>
    %20 = arith.mulf %18, %5 : vector<2x64xf32>
    %21 = arith.mulf %17, %16 : vector<2x64xf32>
    %22 = arith.addf %20, %21 : vector<2x64xf32>
    %23 = math.tanh %22 : vector<2x64xf32>
    %24 = arith.mulf %19, %23 : vector<2x64xf32>
    %25 = vector.extract_strided_slice %24 {offsets = [0, 0], sizes = [2, 32], strides = [1, 1]} : vector<2x64xf32> to vector<2x32xf32>
    %26 = tpu.concatenate %25, %3 in 1 : vector<2x32xf32>, vector<2x32xf32> -> vector<2x64xf32>
    %27 = vector.extract_strided_slice %22 {offsets = [0, 0], sizes = [2, 32], strides = [1, 1]} : vector<2x64xf32> to vector<2x32xf32>
    %28 = tpu.concatenate %27, %3 in 1 : vector<2x32xf32>, vector<2x32xf32> -> vector<2x64xf32>
    %c0_9 = arith.constant 0 : index
    %c1 = arith.constant 1 : index
    %29 = vector.load %arg0[%c0_9, %c1] : memref<2x8xf32, #tpu.memory_space<vmem>>, vector<2x1xf32>
    %30 = tpu.concatenate %26, %29, %1 in 1 : vector<2x64xf32>, vector<2x1xf32>, vector<2x1xf32> -> vector<2x66xf32>
    %cst_10 = arith.constant dense<0.000000e+00> : vector<2x256xf32>
    %31 = tpu.matmul %30, %0, %cst_10 {dimension_numbers = #tpu.dot_dimension_numbers<[1], [0], [0], [1], [0, 0, 1, 1], [], []>} : vector<2x66xf32>, vector<66x256xf32>, vector<2x256xf32> -> vector<2x256xf32>
    %32 = vector.extract_strided_slice %31 {offsets = [0, 0], sizes = [2, 192], strides = [1, 1]} : vector<2x256xf32> to vector<2x192xf32>
    %33 = arith.negf %32 : vector<2x192xf32>
    %34 = math.exp %33 : vector<2x192xf32>
    %cst_11 = arith.constant 1.000000e+00 : f32
    %35 = vector.broadcast %cst_11 : f32 to vector<2x192xf32>
    %36 = arith.addf %35, %34 : vector<2x192xf32>
    %37 = arith.divf %35, %36 : vector<2x192xf32>
    %38 = vector.extract_strided_slice %31 {offsets = [0, 192], sizes = [2, 64], strides = [1, 1]} : vector<2x256xf32> to vector<2x64xf32>
    %39 = math.tanh %38 : vector<2x64xf32>
    %40 = vector.extract_strided_slice %37 {offsets = [0, 0], sizes = [2, 64], strides = [1, 1]} : vector<2x192xf32> to vector<2x64xf32>
    %41 = vector.extract_strided_slice %37 {offsets = [0, 64], sizes = [2, 64], strides = [1, 1]} : vector<2x192xf32> to vector<2x64xf32>
    %42 = vector.extract_strided_slice %37 {offsets = [0, 128], sizes = [2, 64], strides = [1, 1]} : vector<2x192xf32> to vector<2x64xf32>
    %43 = arith.mulf %41, %28 : vector<2x64xf32>
    %44 = arith.mulf %40, %39 : vector<2x64xf32>
    %45 = arith.addf %43, %44 : vector<2x64xf32>
    %46 = math.tanh %45 : vector<2x64xf32>
    %47 = arith.mulf %42, %46 : vector<2x64xf32>
    %c0_12 = arith.constant 0 : index
    %c2 = arith.constant 2 : index
    %48 = vector.load %arg0[%c0_12, %c2] : memref<2x8xf32, #tpu.memory_space<vmem>>, vector<2x1xf32>
    %49 = tpu.concatenate %47, %48, %1 in 1 : vector<2x64xf32>, vector<2x1xf32>, vector<2x1xf32> -> vector<2x66xf32>
    %cst_13 = arith.constant dense<0.000000e+00> : vector<2x256xf32>
    %50 = tpu.matmul %49, %0, %cst_13 {dimension_numbers = #tpu.dot_dimension_numbers<[1], [0], [0], [1], [0, 0, 1, 1], [], []>} : vector<2x66xf32>, vector<66x256xf32>, vector<2x256xf32> -> vector<2x256xf32>
    %51 = vector.extract_strided_slice %50 {offsets = [0, 0], sizes = [2, 192], strides = [1, 1]} : vector<2x256xf32> to vector<2x192xf32>
    %52 = arith.negf %51 : vector<2x192xf32>
    %53 = math.exp %52 : vector<2x192xf32>
    %cst_14 = arith.constant 1.000000e+00 : f32
    %54 = vector.broadcast %cst_14 : f32 to vector<2x192xf32>
    %55 = arith.addf %54, %53 : vector<2x192xf32>
    %56 = arith.divf %54, %55 : vector<2x192xf32>
    %57 = vector.extract_strided_slice %50 {offsets = [0, 192], sizes = [2, 64], strides = [1, 1]} : vector<2x256xf32> to vector<2x64xf32>
    %58 = math.tanh %57 : vector<2x64xf32>
    %59 = vector.extract_strided_slice %56 {offsets = [0, 0], sizes = [2, 64], strides = [1, 1]} : vector<2x192xf32> to vector<2x64xf32>
    %60 = vector.extract_strided_slice %56 {offsets = [0, 64], sizes = [2, 64], strides = [1, 1]} : vector<2x192xf32> to vector<2x64xf32>
    %61 = vector.extract_strided_slice %56 {offsets = [0, 128], sizes = [2, 64], strides = [1, 1]} : vector<2x192xf32> to vector<2x64xf32>
    %62 = arith.mulf %60, %45 : vector<2x64xf32>
    %63 = arith.mulf %59, %58 : vector<2x64xf32>
    %64 = arith.addf %62, %63 : vector<2x64xf32>
    %65 = math.tanh %64 : vector<2x64xf32>
    %66 = arith.mulf %61, %65 : vector<2x64xf32>
    %c0_15 = arith.constant 0 : index
    %c3 = arith.constant 3 : index
    %67 = vector.load %arg0[%c0_15, %c3] : memref<2x8xf32, #tpu.memory_space<vmem>>, vector<2x1xf32>
    %68 = tpu.concatenate %66, %67, %1 in 1 : vector<2x64xf32>, vector<2x1xf32>, vector<2x1xf32> -> vector<2x66xf32>
    %cst_16 = arith.constant dense<0.000000e+00> : vector<2x256xf32>
    %69 = tpu.matmul %68, %0, %cst_16 {dimension_numbers = #tpu.dot_dimension_numbers<[1], [0], [0], [1], [0, 0, 1, 1], [], []>} : vector<2x66xf32>, vector<66x256xf32>, vector<2x256xf32> -> vector<2x256xf32>
    %70 = vector.extract_strided_slice %69 {offsets = [0, 0], sizes = [2, 192], strides = [1, 1]} : vector<2x256xf32> to vector<2x192xf32>
    %71 = arith.negf %70 : vector<2x192xf32>
    %72 = math.exp %71 : vector<2x192xf32>
    %cst_17 = arith.constant 1.000000e+00 : f32
    %73 = vector.broadcast %cst_17 : f32 to vector<2x192xf32>
    %74 = arith.addf %73, %72 : vector<2x192xf32>
    %75 = arith.divf %73, %74 : vector<2x192xf32>
    %76 = vector.extract_strided_slice %69 {offsets = [0, 192], sizes = [2, 64], strides = [1, 1]} : vector<2x256xf32> to vector<2x64xf32>
    %77 = math.tanh %76 : vector<2x64xf32>
    %78 = vector.extract_strided_slice %75 {offsets = [0, 0], sizes = [2, 64], strides = [1, 1]} : vector<2x192xf32> to vector<2x64xf32>
    %79 = vector.extract_strided_slice %75 {offsets = [0, 64], sizes = [2, 64], strides = [1, 1]} : vector<2x192xf32> to vector<2x64xf32>
    %80 = vector.extract_strided_slice %75 {offsets = [0, 128], sizes = [2, 64], strides = [1, 1]} : vector<2x192xf32> to vector<2x64xf32>
    %81 = arith.mulf %79, %64 : vector<2x64xf32>
    %82 = arith.mulf %78, %77 : vector<2x64xf32>
    %83 = arith.addf %81, %82 : vector<2x64xf32>
    %84 = math.tanh %83 : vector<2x64xf32>
    %85 = arith.mulf %80, %84 : vector<2x64xf32>
    %c0_18 = arith.constant 0 : index
    %c4 = arith.constant 4 : index
    %86 = vector.load %arg0[%c0_18, %c4] : memref<2x8xf32, #tpu.memory_space<vmem>>, vector<2x1xf32>
    %87 = tpu.concatenate %85, %86, %1 in 1 : vector<2x64xf32>, vector<2x1xf32>, vector<2x1xf32> -> vector<2x66xf32>
    %cst_19 = arith.constant dense<0.000000e+00> : vector<2x256xf32>
    %88 = tpu.matmul %87, %0, %cst_19 {dimension_numbers = #tpu.dot_dimension_numbers<[1], [0], [0], [1], [0, 0, 1, 1], [], []>} : vector<2x66xf32>, vector<66x256xf32>, vector<2x256xf32> -> vector<2x256xf32>
    %89 = vector.extract_strided_slice %88 {offsets = [0, 0], sizes = [2, 192], strides = [1, 1]} : vector<2x256xf32> to vector<2x192xf32>
    %90 = arith.negf %89 : vector<2x192xf32>
    %91 = math.exp %90 : vector<2x192xf32>
    %cst_20 = arith.constant 1.000000e+00 : f32
    %92 = vector.broadcast %cst_20 : f32 to vector<2x192xf32>
    %93 = arith.addf %92, %91 : vector<2x192xf32>
    %94 = arith.divf %92, %93 : vector<2x192xf32>
    %95 = vector.extract_strided_slice %88 {offsets = [0, 192], sizes = [2, 64], strides = [1, 1]} : vector<2x256xf32> to vector<2x64xf32>
    %96 = math.tanh %95 : vector<2x64xf32>
    %97 = vector.extract_strided_slice %94 {offsets = [0, 0], sizes = [2, 64], strides = [1, 1]} : vector<2x192xf32> to vector<2x64xf32>
    %98 = vector.extract_strided_slice %94 {offsets = [0, 64], sizes = [2, 64], strides = [1, 1]} : vector<2x192xf32> to vector<2x64xf32>
    %99 = vector.extract_strided_slice %94 {offsets = [0, 128], sizes = [2, 64], strides = [1, 1]} : vector<2x192xf32> to vector<2x64xf32>
    %100 = arith.mulf %98, %83 : vector<2x64xf32>
    %101 = arith.mulf %97, %96 : vector<2x64xf32>
    %102 = arith.addf %100, %101 : vector<2x64xf32>
    %103 = math.tanh %102 : vector<2x64xf32>
    %104 = arith.mulf %99, %103 : vector<2x64xf32>
    %c0_21 = arith.constant 0 : index
    %c5 = arith.constant 5 : index
    %105 = vector.load %arg0[%c0_21, %c5] : memref<2x8xf32, #tpu.memory_space<vmem>>, vector<2x1xf32>
    %106 = tpu.concatenate %104, %105, %1 in 1 : vector<2x64xf32>, vector<2x1xf32>, vector<2x1xf32> -> vector<2x66xf32>
    %cst_22 = arith.constant dense<0.000000e+00> : vector<2x256xf32>
    %107 = tpu.matmul %106, %0, %cst_22 {dimension_numbers = #tpu.dot_dimension_numbers<[1], [0], [0], [1], [0, 0, 1, 1], [], []>} : vector<2x66xf32>, vector<66x256xf32>, vector<2x256xf32> -> vector<2x256xf32>
    %108 = vector.extract_strided_slice %107 {offsets = [0, 0], sizes = [2, 192], strides = [1, 1]} : vector<2x256xf32> to vector<2x192xf32>
    %109 = arith.negf %108 : vector<2x192xf32>
    %110 = math.exp %109 : vector<2x192xf32>
    %cst_23 = arith.constant 1.000000e+00 : f32
    %111 = vector.broadcast %cst_23 : f32 to vector<2x192xf32>
    %112 = arith.addf %111, %110 : vector<2x192xf32>
    %113 = arith.divf %111, %112 : vector<2x192xf32>
    %114 = vector.extract_strided_slice %107 {offsets = [0, 192], sizes = [2, 64], strides = [1, 1]} : vector<2x256xf32> to vector<2x64xf32>
    %115 = math.tanh %114 : vector<2x64xf32>
    %116 = vector.extract_strided_slice %113 {offsets = [0, 0], sizes = [2, 64], strides = [1, 1]} : vector<2x192xf32> to vector<2x64xf32>
    %117 = vector.extract_strided_slice %113 {offsets = [0, 64], sizes = [2, 64], strides = [1, 1]} : vector<2x192xf32> to vector<2x64xf32>
    %118 = vector.extract_strided_slice %113 {offsets = [0, 128], sizes = [2, 64], strides = [1, 1]} : vector<2x192xf32> to vector<2x64xf32>
    %119 = arith.mulf %117, %102 : vector<2x64xf32>
    %120 = arith.mulf %116, %115 : vector<2x64xf32>
    %121 = arith.addf %119, %120 : vector<2x64xf32>
    %122 = math.tanh %121 : vector<2x64xf32>
    %123 = arith.mulf %118, %122 : vector<2x64xf32>
    %c0_24 = arith.constant 0 : index
    %c6 = arith.constant 6 : index
    %124 = vector.load %arg0[%c0_24, %c6] : memref<2x8xf32, #tpu.memory_space<vmem>>, vector<2x1xf32>
    %125 = tpu.concatenate %123, %124, %1 in 1 : vector<2x64xf32>, vector<2x1xf32>, vector<2x1xf32> -> vector<2x66xf32>
    %cst_25 = arith.constant dense<0.000000e+00> : vector<2x256xf32>
    %126 = tpu.matmul %125, %0, %cst_25 {dimension_numbers = #tpu.dot_dimension_numbers<[1], [0], [0], [1], [0, 0, 1, 1], [], []>} : vector<2x66xf32>, vector<66x256xf32>, vector<2x256xf32> -> vector<2x256xf32>
    %127 = vector.extract_strided_slice %126 {offsets = [0, 0], sizes = [2, 192], strides = [1, 1]} : vector<2x256xf32> to vector<2x192xf32>
    %128 = arith.negf %127 : vector<2x192xf32>
    %129 = math.exp %128 : vector<2x192xf32>
    %cst_26 = arith.constant 1.000000e+00 : f32
    %130 = vector.broadcast %cst_26 : f32 to vector<2x192xf32>
    %131 = arith.addf %130, %129 : vector<2x192xf32>
    %132 = arith.divf %130, %131 : vector<2x192xf32>
    %133 = vector.extract_strided_slice %126 {offsets = [0, 192], sizes = [2, 64], strides = [1, 1]} : vector<2x256xf32> to vector<2x64xf32>
    %134 = math.tanh %133 : vector<2x64xf32>
    %135 = vector.extract_strided_slice %132 {offsets = [0, 0], sizes = [2, 64], strides = [1, 1]} : vector<2x192xf32> to vector<2x64xf32>
    %136 = vector.extract_strided_slice %132 {offsets = [0, 64], sizes = [2, 64], strides = [1, 1]} : vector<2x192xf32> to vector<2x64xf32>
    %137 = vector.extract_strided_slice %132 {offsets = [0, 128], sizes = [2, 64], strides = [1, 1]} : vector<2x192xf32> to vector<2x64xf32>
    %138 = arith.mulf %136, %121 : vector<2x64xf32>
    %139 = arith.mulf %135, %134 : vector<2x64xf32>
    %140 = arith.addf %138, %139 : vector<2x64xf32>
    %141 = math.tanh %140 : vector<2x64xf32>
    %142 = arith.mulf %137, %141 : vector<2x64xf32>
    %c0_27 = arith.constant 0 : index
    %c7 = arith.constant 7 : index
    %143 = vector.load %arg0[%c0_27, %c7] : memref<2x8xf32, #tpu.memory_space<vmem>>, vector<2x1xf32>
    %144 = tpu.concatenate %142, %143, %1 in 1 : vector<2x64xf32>, vector<2x1xf32>, vector<2x1xf32> -> vector<2x66xf32>
    %cst_28 = arith.constant dense<0.000000e+00> : vector<2x256xf32>
    %145 = tpu.matmul %144, %0, %cst_28 {dimension_numbers = #tpu.dot_dimension_numbers<[1], [0], [0], [1], [0, 0, 1, 1], [], []>} : vector<2x66xf32>, vector<66x256xf32>, vector<2x256xf32> -> vector<2x256xf32>
    %146 = vector.extract_strided_slice %145 {offsets = [0, 0], sizes = [2, 192], strides = [1, 1]} : vector<2x256xf32> to vector<2x192xf32>
    %147 = arith.negf %146 : vector<2x192xf32>
    %148 = math.exp %147 : vector<2x192xf32>
    %cst_29 = arith.constant 1.000000e+00 : f32
    %149 = vector.broadcast %cst_29 : f32 to vector<2x192xf32>
    %150 = arith.addf %149, %148 : vector<2x192xf32>
    %151 = arith.divf %149, %150 : vector<2x192xf32>
    %152 = vector.extract_strided_slice %145 {offsets = [0, 192], sizes = [2, 64], strides = [1, 1]} : vector<2x256xf32> to vector<2x64xf32>
    %153 = math.tanh %152 : vector<2x64xf32>
    %154 = vector.extract_strided_slice %151 {offsets = [0, 0], sizes = [2, 64], strides = [1, 1]} : vector<2x192xf32> to vector<2x64xf32>
    %155 = vector.extract_strided_slice %151 {offsets = [0, 64], sizes = [2, 64], strides = [1, 1]} : vector<2x192xf32> to vector<2x64xf32>
    %156 = vector.extract_strided_slice %151 {offsets = [0, 128], sizes = [2, 64], strides = [1, 1]} : vector<2x192xf32> to vector<2x64xf32>
    %157 = arith.mulf %155, %140 : vector<2x64xf32>
    %158 = arith.mulf %154, %153 : vector<2x64xf32>
    %159 = arith.addf %157, %158 : vector<2x64xf32>
    %160 = math.tanh %159 : vector<2x64xf32>
    %161 = arith.mulf %156, %160 : vector<2x64xf32>
    %162 = tpu.concatenate %161, %2, %1 in 1 : vector<2x64xf32>, vector<2x1xf32>, vector<2x1xf32> -> vector<2x66xf32>
    %cst_30 = arith.constant dense<0.000000e+00> : vector<2x256xf32>
    %163 = tpu.matmul %162, %0, %cst_30 {dimension_numbers = #tpu.dot_dimension_numbers<[1], [0], [0], [1], [0, 0, 1, 1], [], []>} : vector<2x66xf32>, vector<66x256xf32>, vector<2x256xf32> -> vector<2x256xf32>
    %164 = vector.extract_strided_slice %163 {offsets = [0, 0], sizes = [2, 192], strides = [1, 1]} : vector<2x256xf32> to vector<2x192xf32>
    %165 = arith.negf %164 : vector<2x192xf32>
    %166 = math.exp %165 : vector<2x192xf32>
    %cst_31 = arith.constant 1.000000e+00 : f32
    %167 = vector.broadcast %cst_31 : f32 to vector<2x192xf32>
    %168 = arith.addf %167, %166 : vector<2x192xf32>
    %169 = arith.divf %167, %168 : vector<2x192xf32>
    %170 = vector.extract_strided_slice %163 {offsets = [0, 192], sizes = [2, 64], strides = [1, 1]} : vector<2x256xf32> to vector<2x64xf32>
    %171 = math.tanh %170 : vector<2x64xf32>
    %172 = vector.extract_strided_slice %169 {offsets = [0, 0], sizes = [2, 64], strides = [1, 1]} : vector<2x192xf32> to vector<2x64xf32>
    %173 = vector.extract_strided_slice %169 {offsets = [0, 64], sizes = [2, 64], strides = [1, 1]} : vector<2x192xf32> to vector<2x64xf32>
    %174 = vector.extract_strided_slice %169 {offsets = [0, 128], sizes = [2, 64], strides = [1, 1]} : vector<2x192xf32> to vector<2x64xf32>
    %175 = arith.mulf %173, %159 : vector<2x64xf32>
    %176 = arith.mulf %172, %171 : vector<2x64xf32>
    %177 = arith.addf %175, %176 : vector<2x64xf32>
    %178 = math.tanh %177 : vector<2x64xf32>
    %179 = arith.mulf %174, %178 : vector<2x64xf32>
    %180 = vector.extract_strided_slice %179 {offsets = [0, 32], sizes = [2, 32], strides = [1, 1]} : vector<2x64xf32> to vector<2x32xf32>
    %c0_32 = arith.constant 0 : index
    %c0_33 = arith.constant 0 : index
    %181 = vector.load %arg2[%c0_32, %c0_33] : memref<1x32xf32, #tpu.memory_space<vmem>>, vector<1x32xf32>
    %182 = vector.broadcast %181 : vector<1x32xf32> to vector<2x32xf32>
    %183 = arith.mulf %180, %182 : vector<2x32xf32>
    %cst_34 = arith.constant dense<0.000000e+00> : vector<2xf32>
    %184 = vector.multi_reduction <add>, %183, %cst_34 [1] : vector<2x32xf32> to vector<2xf32>
    %185 = vector.shape_cast %184 : vector<2xf32> to vector<2x1xf32>
    %c0_35 = arith.constant 0 : index
    %c0_36 = arith.constant 0 : index
    %186 = vector.load %arg3[%c0_35, %c0_36] : memref<1x1xf32, #tpu.memory_space<vmem>>, vector<1x1xf32>
    %187 = vector.broadcast %186 : vector<1x1xf32> to vector<2x1xf32>
    %188 = arith.addf %185, %187 : vector<2x1xf32>
    %c0_37 = arith.constant 0 : index
    %c0_38 = arith.constant 0 : index
    %189 = vector.load %arg4[%c0_37, %c0_38] : memref<2x1xf32, #tpu.memory_space<vmem>>, vector<2x1xf32>
    tpu.vector_store %arg4[%c0_37, %c0_38], %188 {strides = array<i32>} : memref<2x1xf32, #tpu.memory_space<vmem>>, vector<2x1xf32>,
    return
  }
}

</mosaic_0001>

<bundles_post_ra>
// kernel: lstm_forward.1
= control target key start
LH: loop header
LB: loop body
LE: loop exit
PB: predicated region body
PF: predicated region fallthrough
CT: control target
= control target key end

     0   :  { %s1622_s0 = inlined_call_operand.vmem [shape: f32[2,8], index: 0, kind: input, shape index: {}]   ;;  %s1623_s1 = inlined_call_operand.hbm [shape: f32[66,256], index: 1, kind: input, shape index: {}]   ;;  %s1624_s2 = inlined_call_operand.vmem [shape: f32[1,32], index: 2, kind: input, shape index: {}]   ;;  %s1625_s3 = inlined_call_operand.<no memory space> [shape: f32[1,1], index: 3, kind: input, shape index: {}]   ;;  %s1626_s4 = inlined_call_operand.vmem [shape: f32[2,1], index: 4, kind: output, shape index: {}]  }
   0x1   :  { %v9_v0 = vstv %s1625_s3 }
   0x2   :  { %10 = vst [vmem:[#allocation2] sm:$0x1] %v9_v0 }
   0x3   :  { %11 = vsyncpa [#allocation4], 0  ;;  %s1276_s17 = smov [#allocation3]  }
   0x4   :  { %s19_s18 = sshll.u32 %s1276_s17, 4  ;;  %s20_s18 = int_to_ptr.vmem [resolvable:$true] %s19_s18 }
   0x5   :  { %s1262_s19 = scalar_lea.vmem %s20_s18, 2304  ;;  %p1267_p1 = scmp.lt.s32.totalorder %s20_s18, %s20_s18 }
   0x6   :  { %p1263_p0 = scmp.ne.s32.totalorder %s20_s18, %s1262_s19  ;;  %p1268_p2 = scmp.lt.s32.totalorder %s1262_s19, %s1262_s19 }
   0x8   :  { %p1269_p3 = por %p1268_p2, %p1267_p1 }
   0xa   :  { %p1270_p4 = pnand %p1269_p3, %p1263_p0 }
   0xc   :  { %1273 = shalt.err (!%p1270_p4)
}
   0xd   :  { %s1277_s20 = smov 256   ;;  %s1278_s21 = smov 16  }
   0xe   :  { %25 = dma.hbm_to_vmem [thread:$0]  %s1623_s1, 2304, %s20_s18, [#allocation4], %s1277_s20, %s1277_s20, %s1278_s21  }
   0xf   :  { %1274 = dma.done.wait [#allocation4], 2304  }
  0x10   :  { %1275 = vsyncadd [#allocation4], 4294964992  ;;  %v1279_v1 = vmov 0.0   ;;  %vm64_vm0 = vcmask 1041408   ;;  %v1326_v2 = vld [vmem:[%s1622_s0] sm:$0x3] }
  0x11   :  { %135 = vmatprep.mubr.f32.mxu0 %v1279_v1  ;;  %251 = vmatprep.mubr.f32.mxu1 %v1279_v1  ;;  %v1328_v3 = vld [vmem:[#allocation3 + $0x88] sm:$0x3]  ;;  %v1330_v4 = vld [vmem:[#allocation3 + $0x80] sm:$0x3]  ;;  %s1280_s25 = smov 64   ;;  %v1336_v5 = vld [vmem:[#allocation3 + $0x78] sm:$0xff] }
  0x12   :  { %53 = vrot.lane.b32.xlu0 %v1326_v2, %s1280_s25  ;;  %1085 = vmatprep.subr.msk.mxu0 %vm64_vm0, %v1328_v3  ;;  %v1338_v6 = vld [vmem:[#allocation3 + $0x70] sm:$0xff]  ;;  %v1342_v7 = vld [vmem:[#allocation3 + $0x68] sm:$0xff]  ;;  %v1347_v8 = vld [vmem:[#allocation3 + $0x60] sm:$0xff]  ;;  %vm56_vm1 = vcmask 523264   ;;  %vm58_vm2 = vcmask 531456   ;;  %vm60_vm3 = vcmask 539648  }
  0x13   :  { %1086 = vmatpush1.msk.msra.mxu0 %vm64_vm0, %v1330_v4  ;;  %1090 = vmatprep.subr.msk.mxu1 %vm64_vm0, %v1328_v3  ;;  %v1352_v9 = vld [vmem:[#allocation3 + $0x58] sm:$0xff]  ;;  %v1356_v10 = vld [vmem:[#allocation3 + $0x50] sm:$0xff]  ;;  %v1360_v11 = vld [vmem:[#allocation3 + $0x48] sm:$0xff]  ;;  %s1281_s0 = smov 63   ;;  %vm172_vm4 = vcmask 261120   ;;  %s1282_s1 = smov 62  }
  0x14   :  { %87 = vmatprep.subr.mxu0 %v1336_v5  ;;  %1091 = vmatpush1.msk.msra.mxu1 %vm64_vm0, %v1330_v4  ;;  %v1364_v12 = vld [vmem:[#allocation3 + $0x40] sm:$0xff]  ;;  %v1368_v13 = vld [vmem:[#allocation3 + $0x38] sm:$0xff]  ;;  %v1372_v14 = vld [vmem:[#allocation3 + $0x30] sm:$0xff]  ;;  %s1283_s26 = smov 61   ;;  %s1284_s27 = smov 60   ;;  %vm1066_vm5 = vcmask 254976  }
  0x15   :  { %88 = vmatpush1.msra.mxu0 %v1338_v6  ;;  %203 = vmatprep.subr.mxu1 %v1336_v5  ;;  %v1376_v15 = vld [vmem:[#allocation3 + $0x28] sm:$0xff]  ;;  %v1380_v16 = vld [vmem:[#allocation3 + $0x20] sm:$0xff]  ;;  %v1384_v17 = vld [vmem:[#allocation3 + $0x18] sm:$0xff]  ;;  %s1285_s28 = smov 59   ;;  %s1286_s29 = smov 58   ;;  %vm1078_vm6 = vcmask 1024  }
  0x16   :  { %89 = vmatprep.subr.mxu0 %v1342_v7  ;;  %204 = vmatpush1.msra.mxu1 %v1338_v6  ;;  %v1388_v18 = vld [vmem:[#allocation3 + $0x10] sm:$0xff]  ;;  %v1392_v19 = vld [vmem:[#allocation3 + $0x8] sm:$0xff]  ;;  %v1396_v20 = vld [vmem:[#allocation3] sm:$0xff]  ;;  %s1287_s30 = smov 57   ;;  %s1288_s7 = smov 32  }
  0x17   :  { %90 = vmatpush1.msra.mxu0 %v1347_v8  ;;  %205 = vmatprep.subr.mxu1 %v1342_v7 }
  0x18   :  { %91 = vmatprep.subr.mxu0 %v1352_v9  ;;  %206 = vmatpush1.msra.mxu1 %v1347_v8 }
  0x19   :  { %92 = vmatpush1.msra.mxu0 %v1356_v10  ;;  %207 = vmatprep.subr.mxu1 %v1352_v9 }
  0x1a   :  { %93 = vmatprep.subr.mxu0 %v1360_v11  ;;  %208 = vmatpush1.msra.mxu1 %v1356_v10 }
  0x1b   :  { %94 = vmatpush1.msra.mxu0 %v1364_v12  ;;  %209 = vmatprep.subr.mxu1 %v1360_v11 }
  0x1c   :  { %95 = vmatprep.subr.mxu0 %v1368_v13  ;;  %210 = vmatpush1.msra.mxu1 %v1364_v12 }
  0x1d   :  { %96 = vmatpush1.msra.mxu0 %v1372_v14  ;;  %211 = vmatprep.subr.mxu1 %v1368_v13 }
  0x1e   :  { %97 = vmatprep.subr.mxu0 %v1376_v15  ;;  %212 = vmatpush1.msra.mxu1 %v1372_v14 }
  0x1f   :  { %98 = vmatpush1.msra.mxu0 %v1380_v16  ;;  %213 = vmatprep.subr.mxu1 %v1376_v15 }
  0x20   :  { %99 = vmatprep.subr.mxu0 %v1384_v17  ;;  %214 = vmatpush1.msra.mxu1 %v1380_v16 }
  0x21   :  { %100 = vmatpush1.msra.mxu0 %v1388_v18  ;;  %215 = vmatprep.subr.mxu1 %v1384_v17 }
  0x22   :  { %101 = vmatprep.subr.mxu0 %v1392_v19  ;;  %216 = vmatpush1.msra.mxu1 %v1388_v18 }
  0x23   :  { %102 = vmatpush1.msra.mxu0 %v1396_v20  ;;  %217 = vmatprep.subr.mxu1 %v1392_v19 }
  0x24   :  { %218 = vmatpush1.msra.mxu1 %v1396_v20  ;;  %1095 = vmatprep.subr.msk.mxu0 %vm64_vm0, %v1328_v3 }
  0x25   :  { %1100 = vmatprep.subr.msk.mxu1 %vm64_vm0, %v1328_v3 }
  0x84   :  { %v54_v21 = vpop.permute.xlu0 %53 }
  0x85   :  { %v57_v22 = vsel %vm56_vm1, 0.0, %v54_v21 }
  0x86   :  { %v59_v23 = vsel %vm58_vm2, %v57_v22, 1.0 }
  0x87   :  { %1087 = vmatmul.mubr.msk.f32.vlgmr.msra.gmra.mxu0 %vm60_vm3, %v59_v23 }
  0x88   :  { %1096 = vmatpush1.msk.msra.mxu0 %vm64_vm0, %v1330_v4  ;;  %364 = vmatprep.mubr.f32.mxu0 %v1279_v1 }
  0x89   :  { %316 = vmatprep.subr.mxu0 %v1336_v5 }
  0x8a   :  { %317 = vmatpush1.msra.mxu0 %v1338_v6 }
  0x8b   :  { %318 = vmatprep.subr.mxu0 %v1342_v7 }
  0x8c   :  { %319 = vmatpush1.msra.mxu0 %v1347_v8 }
  0x8d   :  { %320 = vmatprep.subr.mxu0 %v1352_v9 }
  0x8e   :  { %321 = vmatpush1.msra.mxu0 %v1356_v10 }
  0x8f   :  { %322 = vmatprep.subr.mxu0 %v1360_v11 }
  0x90   :  { %323 = vmatpush1.msra.mxu0 %v1364_v12 }
  0x91   :  { %324 = vmatprep.subr.mxu0 %v1368_v13 }
  0x92   :  { %325 = vmatpush1.msra.mxu0 %v1372_v14 }
  0x93   :  { %326 = vmatprep.subr.mxu0 %v1376_v15 }
  0x94   :  { %327 = vmatpush1.msra.mxu0 %v1380_v16 }
  0x95   :  { %328 = vmatprep.subr.mxu0 %v1384_v17 }
  0x96   :  { %329 = vmatpush1.msra.mxu0 %v1388_v18 }
  0x97   :  { %330 = vmatprep.subr.mxu0 %v1392_v19 }
  0x98   :  { %331 = vmatpush1.msra.mxu0 %v1396_v20 }
  0x99   :  { %1105 = vmatprep.subr.msk.mxu0 %vm64_vm0, %v1328_v3 }
 0x147   :  { %v137_v24 = vpop.f32.mrf.mxu0 }
 0x148   :  { %v1088_v27 = vmul.f32 -1.442695, %v137_v24 }
 0x149   :  { %v139_v25 = vpop.f32.mrf.mxu0 }
 0x14a   :  { %1146 = vtanh.f32 %v139_v25  ;;  %v1089_v37 = vmul.f32 -1.442695, %v139_v25 }
 0x14b   :  { %1148 = vpow2.f32 %v1088_v27 }
 0x157   :  { %v1147_v26 = vpop.eup %1146 }
 0x158   :  { %157 = vrot.lane.b32.xlu0 %v1147_v26, %s1280_s25  ;;  %v1149_v28 = vpop.eup %1148 }
 0x159   :  { %v148_v29 = vadd.f32 1.0, %v1149_v28 }
 0x15b   :  { %1150 = vrcp.f32 %v148_v29 }
 0x15c   :  { %179 = vrot.lane.b32.xlu0 %v1326_v2, %s1281_s0 }
 0x168   :  { %v1151_v30 = vpop.eup %1150 }
 0x169   :  { %v155_v33 = vmul.f32 0.0, %v1151_v30 }
 0x1ca   :  { %v158_v31 = vpop.permute.xlu0 %157 }
 0x1cb   :  { %v160_v32 = vmul.f32 %v1151_v30, %v158_v31 }
 0x1cd   :  { %162 = vrot.lane.b32.xlu1 %v160_v32, %s1280_s25 }
 0x1ce   :  { %v180_v43 = vpop.permute.xlu0 %179 }
 0x23f   :  { %v163_v34 = vpop.permute.xlu1 %162 }
 0x240   :  { %v165_v35 = vadd.f32 %v163_v34, %v155_v33 }
 0x242   :  { %1152 = vtanh.f32 %v165_v35 }
 0x243   :  { %1154 = vpow2.f32 %v1089_v37 }
 0x24f   :  { %v1153_v36 = vpop.eup %1152 }
 0x250   :  { %168 = vrot.lane.b32.xlu1 %v1153_v36, %s1280_s25  ;;  %v1155_v38 = vpop.eup %1154 }
 0x251   :  { %v149_v39 = vadd.f32 1.0, %v1155_v38 }
 0x253   :  { %1156 = vrcp.f32 %v149_v39 }
 0x254   :  { %175 = vrot.lane.b32.xlu1 %v165_v35, %s1280_s25 }
 0x260   :  { %v1157_v40 = vpop.eup %1156 }
 0x2c2   :  { %v169_v41 = vpop.permute.xlu1 %168 }
 0x2c3   :  { %v171_v42 = vmul.f32 %v1157_v40, %v169_v41 }
 0x2c5   :  { %v173_v44 = vsel %vm172_vm4, %v171_v42, 0.0 }
 0x2c6   :  { %v176_v45 = vpop.permute.xlu1 %175  ;;  %v182_v46 = vsel %vm56_vm1, %v173_v44, %v180_v43 }
 0x2c7   :  { %v178_v47 = vsel %vm172_vm4, %v176_v45, 0.0  ;;  %v183_v48 = vsel %vm58_vm2, %v182_v46, 1.0 }
 0x2c8   :  { %272 = vrot.lane.b32.xlu1 %v178_v47, %s1280_s25  ;;  %1092 = vmatmul.mubr.msk.f32.vlgmr.msra.gmra.mxu1 %vm60_vm3, %v183_v48 }
 0x2c9   :  { %1101 = vmatpush1.msk.msra.mxu1 %vm64_vm0, %v1330_v4  ;;  %473 = vmatprep.mubr.f32.mxu1 %v1279_v1 }
 0x2ca   :  { %425 = vmatprep.subr.mxu1 %v1336_v5 }
 0x2cb   :  { %426 = vmatpush1.msra.mxu1 %v1338_v6 }
 0x2cc   :  { %427 = vmatprep.subr.mxu1 %v1342_v7 }
 0x2cd   :  { %428 = vmatpush1.msra.mxu1 %v1347_v8 }
 0x2ce   :  { %429 = vmatprep.subr.mxu1 %v1352_v9 }
 0x2cf   :  { %430 = vmatpush1.msra.mxu1 %v1356_v10 }
 0x2d0   :  { %431 = vmatprep.subr.mxu1 %v1360_v11 }
 0x2d1   :  { %432 = vmatpush1.msra.mxu1 %v1364_v12 }
 0x2d2   :  { %433 = vmatprep.subr.mxu1 %v1368_v13 }
 0x2d3   :  { %434 = vmatpush1.msra.mxu1 %v1372_v14 }
 0x2d4   :  { %435 = vmatprep.subr.mxu1 %v1376_v15 }
 0x2d5   :  { %436 = vmatpush1.msra.mxu1 %v1380_v16 }
 0x2d6   :  { %437 = vmatprep.subr.mxu1 %v1384_v17 }
 0x2d7   :  { %438 = vmatpush1.msra.mxu1 %v1388_v18 }
 0x2d8   :  { %439 = vmatprep.subr.mxu1 %v1392_v19 }
 0x2d9   :  { %440 = vmatpush1.msra.mxu1 %v1396_v20 }
 0x2da   :  { %1110 = vmatprep.subr.msk.mxu1 %vm64_vm0, %v1328_v3 }
 0x33a   :  { %v273_v58 = vpop.permute.xlu1 %272 }
 0x388   :  { %v253_v49 = vpop.f32.mrf.mxu1 }
 0x389   :  { %v1093_v52 = vmul.f32 -1.442695, %v253_v49 }
 0x38a   :  { %v255_v50 = vpop.f32.mrf.mxu1 }
 0x38b   :  { %1158 = vtanh.f32 %v255_v50  ;;  %v1094_v63 = vmul.f32 -1.442695, %v255_v50 }
 0x38c   :  { %1160 = vpow2.f32 %v1093_v52 }
 0x398   :  { %v1159_v51 = vpop.eup %1158 }
 0x399   :  { %277 = vrot.lane.b32.xlu0 %v1159_v51, %s1280_s25  ;;  %v1161_v53 = vpop.eup %1160 }
 0x39a   :  { %v264_v54 = vadd.f32 1.0, %v1161_v53 }
 0x39c   :  { %1162 = vrcp.f32 %v264_v54 }
 0x3a9   :  { %v1163_v55 = vpop.eup %1162 }
 0x3aa   :  { %v275_v59 = vmul.f32 %v1163_v55, %v273_v58 }
 0x40b   :  { %v278_v56 = vpop.permute.xlu0 %277 }
 0x40c   :  { %v280_v57 = vmul.f32 %v1163_v55, %v278_v56 }
 0x40e   :  { %282 = vrot.lane.b32.xlu0 %v280_v57, %s1280_s25 }
 0x412   :  { %292 = vrot.lane.b32.xlu0 %v1326_v2, %s1282_s1 }
 0x480   :  { %v283_v60 = vpop.permute.xlu0 %282 }
 0x481   :  { %v285_v61 = vadd.f32 %v283_v60, %v275_v59 }
 0x483   :  { %1164 = vtanh.f32 %v285_v61 }
 0x484   :  { %1166 = vpow2.f32 %v1094_v63  ;;  %v293_v24 = vpop.permute.xlu0 %292 }
 0x490   :  { %v1165_v62 = vpop.eup %1164 }
 0x491   :  { %288 = vrot.lane.b32.xlu1 %v1165_v62, %s1280_s25  ;;  %v1167_v0 = vpop.eup %1166 }
 0x492   :  { %v265_v21 = vadd.f32 1.0, %v1167_v0 }
 0x494   :  { %1168 = vrcp.f32 %v265_v21 }
 0x4a1   :  { %v1169_v22 = vpop.eup %1168 }
 0x503   :  { %v289_v23 = vpop.permute.xlu1 %288 }
 0x504   :  { %v291_v25 = vmul.f32 %v1169_v22, %v289_v23 }
 0x506   :  { %v295_v26 = vsel %vm56_vm1, %v291_v25, %v293_v24 }
 0x507   :  { %v296_v27 = vsel %vm58_vm2, %v295_v26, 1.0 }
 0x508   :  { %1097 = vmatmul.mubr.msk.f32.vlgmr.msra.gmra.mxu0 %vm60_vm3, %v296_v27 }
 0x509   :  { %1106 = vmatpush1.msk.msra.mxu0 %vm64_vm0, %v1330_v4  ;;  %582 = vmatprep.mubr.f32.mxu0 %v1279_v1 }
 0x50a   :  { %534 = vmatprep.subr.mxu0 %v1336_v5 }
 0x50b   :  { %535 = vmatpush1.msra.mxu0 %v1338_v6 }
 0x50c   :  { %536 = vmatprep.subr.mxu0 %v1342_v7 }
 0x50d   :  { %537 = vmatpush1.msra.mxu0 %v1347_v8 }
 0x50e   :  { %538 = vmatprep.subr.mxu0 %v1352_v9 }
 0x50f   :  { %539 = vmatpush1.msra.mxu0 %v1356_v10 }
 0x510   :  { %540 = vmatprep.subr.mxu0 %v1360_v11 }
 0x511   :  { %541 = vmatpush1.msra.mxu0 %v1364_v12 }
 0x512   :  { %542 = vmatprep.subr.mxu0 %v1368_v13 }
 0x513   :  { %543 = vmatpush1.msra.mxu0 %v1372_v14 }
 0x514   :  { %544 = vmatprep.subr.mxu0 %v1376_v15 }
 0x515   :  { %545 = vmatpush1.msra.mxu0 %v1380_v16 }
 0x516   :  { %546 = vmatprep.subr.mxu0 %v1384_v17 }
 0x517   :  { %547 = vmatpush1.msra.mxu0 %v1388_v18 }
 0x518   :  { %548 = vmatprep.subr.mxu0 %v1392_v19 }
 0x519   :  { %549 = vmatpush1.msra.mxu0 %v1396_v20 }
 0x51a   :  { %1115 = vmatprep.subr.msk.mxu0 %vm64_vm0, %v1328_v3 }
 0x5c8   :  { %v366_v28 = vpop.f32.mrf.mxu0 }
 0x5c9   :  { %v1098_v31 = vmul.f32 -1.442695, %v366_v28 }
 0x5ca   :  { %v368_v29 = vpop.f32.mrf.mxu0 }
 0x5cb   :  { %1170 = vtanh.f32 %v368_v29  ;;  %v1099_v41 = vmul.f32 -1.442695, %v368_v29 }
 0x5cc   :  { %1172 = vpow2.f32 %v1098_v31 }
 0x5d8   :  { %v1171_v30 = vpop.eup %1170 }
 0x5d9   :  { %386 = vrot.lane.b32.xlu1 %v1171_v30, %s1280_s25  ;;  %v1173_v32 = vpop.eup %1172 }
 0x5da   :  { %v377_v33 = vadd.f32 1.0, %v1173_v32 }
 0x5dc   :  { %1174 = vrcp.f32 %v377_v33 }
 0x5e9   :  { %v1175_v34 = vpop.eup %1174 }
 0x5ea   :  { %v384_v37 = vmul.f32 %v1175_v34, %v285_v61 }
 0x64b   :  { %v387_v35 = vpop.permute.xlu1 %386 }
 0x64c   :  { %v389_v36 = vmul.f32 %v1175_v34, %v387_v35 }
 0x64e   :  { %391 = vrot.lane.b32.xlu0 %v389_v36, %s1280_s25 }
 0x652   :  { %401 = vrot.lane.b32.xlu0 %v1326_v2, %s1283_s26 }
 0x6c0   :  { %v392_v38 = vpop.permute.xlu0 %391 }
 0x6c1   :  { %v394_v39 = vadd.f32 %v392_v38, %v384_v37 }
 0x6c3   :  { %1176 = vtanh.f32 %v394_v39 }
 0x6c4   :  { %1178 = vpow2.f32 %v1099_v41  ;;  %v402_v46 = vpop.permute.xlu0 %401 }
 0x6d0   :  { %v1177_v40 = vpop.eup %1176 }
 0x6d1   :  { %397 = vrot.lane.b32.xlu1 %v1177_v40, %s1280_s25  ;;  %v1179_v42 = vpop.eup %1178 }
 0x6d2   :  { %v378_v43 = vadd.f32 1.0, %v1179_v42 }
 0x6d4   :  { %1180 = vrcp.f32 %v378_v43 }
 0x6e1   :  { %v1181_v44 = vpop.eup %1180 }
 0x743   :  { %v398_v45 = vpop.permute.xlu1 %397 }
 0x744   :  { %v400_v47 = vmul.f32 %v1181_v44, %v398_v45 }
 0x746   :  { %v404_v48 = vsel %vm56_vm1, %v400_v47, %v402_v46 }
 0x747   :  { %v405_v49 = vsel %vm58_vm2, %v404_v48, 1.0 }
 0x748   :  { %1102 = vmatmul.mubr.msk.f32.vlgmr.msra.gmra.mxu1 %vm60_vm3, %v405_v49 }
 0x749   :  { %1111 = vmatpush1.msk.msra.mxu1 %vm64_vm0, %v1330_v4  ;;  %691 = vmatprep.mubr.f32.mxu1 %v1279_v1 }
 0x74a   :  { %643 = vmatprep.subr.mxu1 %v1336_v5 }
 0x74b   :  { %644 = vmatpush1.msra.mxu1 %v1338_v6 }
 0x74c   :  { %645 = vmatprep.subr.mxu1 %v1342_v7 }
 0x74d   :  { %646 = vmatpush1.msra.mxu1 %v1347_v8 }
 0x74e   :  { %647 = vmatprep.subr.mxu1 %v1352_v9 }
 0x74f   :  { %648 = vmatpush1.msra.mxu1 %v1356_v10 }
 0x750   :  { %649 = vmatprep.subr.mxu1 %v1360_v11 }
 0x751   :  { %650 = vmatpush1.msra.mxu1 %v1364_v12 }
 0x752   :  { %651 = vmatprep.subr.mxu1 %v1368_v13 }
 0x753   :  { %652 = vmatpush1.msra.mxu1 %v1372_v14 }
 0x754   :  { %653 = vmatprep.subr.mxu1 %v1376_v15 }
 0x755   :  { %654 = vmatpush1.msra.mxu1 %v1380_v16 }
 0x756   :  { %655 = vmatprep.subr.mxu1 %v1384_v17 }
 0x757   :  { %656 = vmatpush1.msra.mxu1 %v1388_v18 }
 0x758   :  { %657 = vmatprep.subr.mxu1 %v1392_v19 }
 0x759   :  { %658 = vmatpush1.msra.mxu1 %v1396_v20 }
 0x75a   :  { %1120 = vmatprep.subr.msk.mxu1 %vm64_vm0, %v1328_v3 }
 0x808   :  { %v475_v50 = vpop.f32.mrf.mxu1 }
 0x809   :  { %v1103_v53 = vmul.f32 -1.442695, %v475_v50 }
 0x80a   :  { %v477_v51 = vpop.f32.mrf.mxu1 }
 0x80b   :  { %1182 = vtanh.f32 %v477_v51  ;;  %v1104_v63 = vmul.f32 -1.442695, %v477_v51 }
 0x80c   :  { %1184 = vpow2.f32 %v1103_v53 }
 0x818   :  { %v1183_v52 = vpop.eup %1182 }
 0x819   :  { %495 = vrot.lane.b32.xlu1 %v1183_v52, %s1280_s25  ;;  %v1185_v54 = vpop.eup %1184 }
 0x81a   :  { %v486_v55 = vadd.f32 1.0, %v1185_v54 }
 0x81c   :  { %1186 = vrcp.f32 %v486_v55 }
 0x829   :  { %v1187_v56 = vpop.eup %1186 }
 0x82a   :  { %v493_v59 = vmul.f32 %v1187_v56, %v394_v39 }
 0x88b   :  { %v496_v57 = vpop.permute.xlu1 %495 }
 0x88c   :  { %v498_v58 = vmul.f32 %v1187_v56, %v496_v57 }
 0x88e   :  { %500 = vrot.lane.b32.xlu0 %v498_v58, %s1280_s25 }
 0x892   :  { %510 = vrot.lane.b32.xlu0 %v1326_v2, %s1284_s27 }
 0x900   :  { %v501_v60 = vpop.permute.xlu0 %500 }
 0x901   :  { %v503_v61 = vadd.f32 %v501_v60, %v493_v59 }
 0x903   :  { %1188 = vtanh.f32 %v503_v61 }
 0x904   :  { %1190 = vpow2.f32 %v1104_v63  ;;  %v511_v24 = vpop.permute.xlu0 %510 }
 0x910   :  { %v1189_v62 = vpop.eup %1188 }
 0x911   :  { %506 = vrot.lane.b32.xlu1 %v1189_v62, %s1280_s25  ;;  %v1191_v0 = vpop.eup %1190 }
 0x912   :  { %v487_v21 = vadd.f32 1.0, %v1191_v0 }
 0x914   :  { %1192 = vrcp.f32 %v487_v21 }
 0x921   :  { %v1193_v22 = vpop.eup %1192 }
 0x983   :  { %v507_v23 = vpop.permute.xlu1 %506 }
 0x984   :  { %v509_v25 = vmul.f32 %v1193_v22, %v507_v23 }
 0x986   :  { %v513_v26 = vsel %vm56_vm1, %v509_v25, %v511_v24 }
 0x987   :  { %v514_v27 = vsel %vm58_vm2, %v513_v26, 1.0 }
 0x988   :  { %1107 = vmatmul.mubr.msk.f32.vlgmr.msra.gmra.mxu0 %vm60_vm3, %v514_v27 }
 0x989   :  { %1116 = vmatpush1.msk.msra.mxu0 %vm64_vm0, %v1330_v4  ;;  %800 = vmatprep.mubr.f32.mxu0 %v1279_v1 }
 0x98a   :  { %752 = vmatprep.subr.mxu0 %v1336_v5 }
 0x98b   :  { %753 = vmatpush1.msra.mxu0 %v1338_v6 }
 0x98c   :  { %754 = vmatprep.subr.mxu0 %v1342_v7 }
 0x98d   :  { %755 = vmatpush1.msra.mxu0 %v1347_v8 }
 0x98e   :  { %756 = vmatprep.subr.mxu0 %v1352_v9 }
 0x98f   :  { %757 = vmatpush1.msra.mxu0 %v1356_v10 }
 0x990   :  { %758 = vmatprep.subr.mxu0 %v1360_v11 }
 0x991   :  { %759 = vmatpush1.msra.mxu0 %v1364_v12 }
 0x992   :  { %760 = vmatprep.subr.mxu0 %v1368_v13 }
 0x993   :  { %761 = vmatpush1.msra.mxu0 %v1372_v14 }
 0x994   :  { %762 = vmatprep.subr.mxu0 %v1376_v15 }
 0x995   :  { %763 = vmatpush1.msra.mxu0 %v1380_v16 }
 0x996   :  { %764 = vmatprep.subr.mxu0 %v1384_v17 }
 0x997   :  { %765 = vmatpush1.msra.mxu0 %v1388_v18 }
 0x998   :  { %766 = vmatprep.subr.mxu0 %v1392_v19 }
 0x999   :  { %767 = vmatpush1.msra.mxu0 %v1396_v20 }
 0x99a   :  { %1125 = vmatprep.subr.msk.mxu0 %vm64_vm0, %v1328_v3 }
 0xa48   :  { %v584_v28 = vpop.f32.mrf.mxu0 }
 0xa49   :  { %v1108_v31 = vmul.f32 -1.442695, %v584_v28 }
 0xa4a   :  { %v586_v29 = vpop.f32.mrf.mxu0 }
 0xa4b   :  { %1194 = vtanh.f32 %v586_v29  ;;  %v1109_v40 = vmul.f32 -1.442695, %v586_v29 }
 0xa4c   :  { %1196 = vpow2.f32 %v1108_v31 }
 0xa58   :  { %v1195_v30 = vpop.eup %1194 }
 0xa59   :  { %604 = vrot.lane.b32.xlu1 %v1195_v30, %s1280_s25  ;;  %v1197_v32 = vpop.eup %1196 }
 0xa5a   :  { %v595_v33 = vadd.f32 1.0, %v1197_v32 }
 0xa5c   :  { %1198 = vrcp.f32 %v595_v33 }
 0xa69   :  { %v1199_v34 = vpop.eup %1198 }
 0xa6a   :  { %v602_v3 = vmul.f32 %v1199_v34, %v503_v61 }
 0xacb   :  { %v605_v35 = vpop.permute.xlu1 %604 }
 0xacc   :  { %v607_v36 = vmul.f32 %v1199_v34, %v605_v35 }
 0xace   :  { %609 = vrot.lane.b32.xlu0 %v607_v36, %s1280_s25 }
 0xad2   :  { %619 = vrot.lane.b32.xlu0 %v1326_v2, %s1285_s28 }
 0xb40   :  { %v610_v37 = vpop.permute.xlu0 %609 }
 0xb41   :  { %v612_v38 = vadd.f32 %v610_v37, %v602_v3 }
 0xb43   :  { %1200 = vtanh.f32 %v612_v38 }
 0xb44   :  { %1202 = vpow2.f32 %v1109_v40  ;;  %v620_v45 = vpop.permute.xlu0 %619 }
 0xb50   :  { %v1201_v39 = vpop.eup %1200 }
 0xb51   :  { %615 = vrot.lane.b32.xlu1 %v1201_v39, %s1280_s25  ;;  %v1203_v41 = vpop.eup %1202 }
 0xb52   :  { %v596_v42 = vadd.f32 1.0, %v1203_v41 }
 0xb54   :  { %1204 = vrcp.f32 %v596_v42 }
 0xb61   :  { %v1205_v43 = vpop.eup %1204 }
 0xbc3   :  { %v616_v44 = vpop.permute.xlu1 %615 }
 0xbc4   :  { %v618_v46 = vmul.f32 %v1205_v43, %v616_v44 }
 0xbc6   :  { %v622_v47 = vsel %vm56_vm1, %v618_v46, %v620_v45 }
 0xbc7   :  { %v623_v48 = vsel %vm58_vm2, %v622_v47, 1.0 }
 0xbc8   :  { %1112 = vmatmul.mubr.msk.f32.vlgmr.msra.gmra.mxu1 %vm60_vm3, %v623_v48 }
 0xbc9   :  { %1121 = vmatpush1.msk.msra.mxu1 %vm64_vm0, %v1330_v4  ;;  %909 = vmatprep.mubr.f32.mxu1 %v1279_v1 }
 0xbca   :  { %861 = vmatprep.subr.mxu1 %v1336_v5 }
 0xbcb   :  { %862 = vmatpush1.msra.mxu1 %v1338_v6 }
 0xbcc   :  { %863 = vmatprep.subr.mxu1 %v1342_v7 }
 0xbcd   :  { %864 = vmatpush1.msra.mxu1 %v1347_v8 }
 0xbce   :  { %865 = vmatprep.subr.mxu1 %v1352_v9 }
 0xbcf   :  { %866 = vmatpush1.msra.mxu1 %v1356_v10 }
 0xbd0   :  { %867 = vmatprep.subr.mxu1 %v1360_v11 }
 0xbd1   :  { %868 = vmatpush1.msra.mxu1 %v1364_v12 }
 0xbd2   :  { %869 = vmatprep.subr.mxu1 %v1368_v13 }
 0xbd3   :  { %870 = vmatpush1.msra.mxu1 %v1372_v14 }
 0xbd4   :  { %871 = vmatprep.subr.mxu1 %v1376_v15 }
 0xbd5   :  { %872 = vmatpush1.msra.mxu1 %v1380_v16 }
 0xbd6   :  { %873 = vmatprep.subr.mxu1 %v1384_v17 }
 0xbd7   :  { %874 = vmatpush1.msra.mxu1 %v1388_v18 }
 0xbd8   :  { %875 = vmatprep.subr.mxu1 %v1392_v19 }
 0xbd9   :  { %876 = vmatpush1.msra.mxu1 %v1396_v20 }
 0xc88   :  { %v693_v49 = vpop.f32.mrf.mxu1 }
 0xc89   :  { %v1113_v52 = vmul.f32 -1.442695, %v693_v49 }
 0xc8a   :  { %v695_v50 = vpop.f32.mrf.mxu1 }
 0xc8b   :  { %1206 = vtanh.f32 %v695_v50  ;;  %v1114_v62 = vmul.f32 -1.442695, %v695_v50 }
 0xc8c   :  { %1208 = vpow2.f32 %v1113_v52 }
 0xc98   :  { %v1207_v51 = vpop.eup %1206 }
 0xc99   :  { %713 = vrot.lane.b32.xlu1 %v1207_v51, %s1280_s25  ;;  %v1209_v53 = vpop.eup %1208 }
 0xc9a   :  { %v704_v54 = vadd.f32 1.0, %v1209_v53 }
 0xc9c   :  { %1210 = vrcp.f32 %v704_v54 }
 0xca9   :  { %v1211_v55 = vpop.eup %1210 }
 0xcaa   :  { %v711_v58 = vmul.f32 %v1211_v55, %v612_v38 }
 0xd0b   :  { %v714_v56 = vpop.permute.xlu1 %713 }
 0xd0c   :  { %v716_v57 = vmul.f32 %v1211_v55, %v714_v56 }
 0xd0e   :  { %718 = vrot.lane.b32.xlu0 %v716_v57, %s1280_s25 }
 0xd12   :  { %728 = vrot.lane.b32.xlu0 %v1326_v2, %s1286_s29 }
 0xd80   :  { %v719_v59 = vpop.permute.xlu0 %718 }
 0xd81   :  { %v721_v60 = vadd.f32 %v719_v59, %v711_v58  ;;  %v1130_v59 = vld [vmem:[%s1624_s2] ss:$0 sm:$0xff]  ;;  %s1289_s2 = smov 96  }
 0xd83   :  { %1212 = vtanh.f32 %v721_v60 }
 0xd84   :  { %1214 = vpow2.f32 %v1114_v62  ;;  %v729_v23 = vpop.permute.xlu0 %728 }
 0xd90   :  { %v1213_v61 = vpop.eup %1212 }
 0xd91   :  { %724 = vrot.lane.b32.xlu1 %v1213_v61, %s1280_s25  ;;  %v1215_v63 = vpop.eup %1214 }
 0xd92   :  { %v705_v0 = vadd.f32 1.0, %v1215_v63 }
 0xd94   :  { %1216 = vrcp.f32 %v705_v0 }
 0xda1   :  { %v1217_v21 = vpop.eup %1216 }
 0xe03   :  { %v725_v22 = vpop.permute.xlu1 %724 }
 0xe04   :  { %v727_v24 = vmul.f32 %v1217_v21, %v725_v22 }
 0xe06   :  { %v731_v25 = vsel %vm56_vm1, %v727_v24, %v729_v23 }
 0xe07   :  { %v732_v26 = vsel %vm58_vm2, %v731_v25, 1.0 }
 0xe08   :  { %1117 = vmatmul.mubr.msk.f32.vlgmr.msra.gmra.mxu0 %vm60_vm3, %v732_v26 }
 0xe09   :  { %1126 = vmatpush1.msk.msra.mxu0 %vm64_vm0, %v1330_v4  ;;  %1015 = vmatprep.mubr.f32.mxu0 %v1279_v1 }
 0xe0a   :  { %967 = vmatprep.subr.mxu0 %v1336_v5 }
 0xe0b   :  { %968 = vmatpush1.msra.mxu0 %v1338_v6 }
 0xe0c   :  { %969 = vmatprep.subr.mxu0 %v1342_v7 }
 0xe0d   :  { %970 = vmatpush1.msra.mxu0 %v1347_v8 }
 0xe0e   :  { %971 = vmatprep.subr.mxu0 %v1352_v9 }
 0xe0f   :  { %972 = vmatpush1.msra.mxu0 %v1356_v10 }
 0xe10   :  { %973 = vmatprep.subr.mxu0 %v1360_v11 }
 0xe11   :  { %974 = vmatpush1.msra.mxu0 %v1364_v12 }
 0xe12   :  { %975 = vmatprep.subr.mxu0 %v1368_v13 }
 0xe13   :  { %976 = vmatpush1.msra.mxu0 %v1372_v14 }
 0xe14   :  { %977 = vmatprep.subr.mxu0 %v1376_v15 }
 0xe15   :  { %978 = vmatpush1.msra.mxu0 %v1380_v16 }
 0xe16   :  { %979 = vmatprep.subr.mxu0 %v1384_v17 }
 0xe17   :  { %980 = vmatpush1.msra.mxu0 %v1388_v18 }
 0xe18   :  { %981 = vmatprep.subr.mxu0 %v1392_v19 }
 0xe19   :  { %982 = vmatpush1.msra.mxu0 %v1396_v20 }
 0xec8   :  { %v802_v1 = vpop.f32.mrf.mxu0 }
 0xec9   :  { %v1118_v6 = vmul.f32 -1.442695, %v802_v1 }
 0xeca   :  { %v804_v4 = vpop.f32.mrf.mxu0 }
 0xecb   :  { %1218 = vtanh.f32 %v804_v4  ;;  %v1119_v16 = vmul.f32 -1.442695, %v804_v4 }
 0xecc   :  { %1220 = vpow2.f32 %v1118_v6  ;;  %v1131_v6 = vld [vmem:[#allocation2] ss:$0 sm:$0xff] }
 0xed8   :  { %v1219_v5 = vpop.eup %1218 }
 0xed9   :  { %822 = vrot.lane.b32.xlu1 %v1219_v5, %s1280_s25  ;;  %v1221_v7 = vpop.eup %1220 }
 0xeda   :  { %v813_v8 = vadd.f32 1.0, %v1221_v7 }
 0xedc   :  { %1222 = vrcp.f32 %v813_v8 }
 0xee9   :  { %v1223_v9 = vpop.eup %1222 }
 0xeea   :  { %v820_v12 = vmul.f32 %v1223_v9, %v721_v60 }
 0xf4b   :  { %v823_v10 = vpop.permute.xlu1 %822 }
 0xf4c   :  { %v825_v11 = vmul.f32 %v1223_v9, %v823_v10 }
 0xf4e   :  { %827 = vrot.lane.b32.xlu0 %v825_v11, %s1280_s25 }
 0xf52   :  { %837 = vrot.lane.b32.xlu0 %v1326_v2, %s1287_s30 }
 0xfc0   :  { %v828_v13 = vpop.permute.xlu0 %827 }
 0xfc1   :  { %v830_v14 = vadd.f32 %v828_v13, %v820_v12 }
 0xfc3   :  { %1224 = vtanh.f32 %v830_v14 }
 0xfc4   :  { %1226 = vpow2.f32 %v1119_v16  ;;  %v838_v27 = vpop.permute.xlu0 %837 }
 0xfd0   :  { %v1225_v15 = vpop.eup %1224 }
 0xfd1   :  { %833 = vrot.lane.b32.xlu1 %v1225_v15, %s1280_s25  ;;  %v1227_v17 = vpop.eup %1226 }
 0xfd2   :  { %v814_v18 = vadd.f32 1.0, %v1227_v17 }
 0xfd4   :  { %1228 = vrcp.f32 %v814_v18 }
 0xfe1   :  { %v1229_v19 = vpop.eup %1228 }
0x1043   :  { %v834_v20 = vpop.permute.xlu1 %833 }
0x1044   :  { %v836_v28 = vmul.f32 %v1229_v19, %v834_v20 }
0x1046   :  { %v840_v29 = vsel %vm56_vm1, %v836_v28, %v838_v27 }
0x1047   :  { %v841_v2 = vsel %vm58_vm2, %v840_v29, 1.0 }
0x1048   :  { %1122 = vmatmul.mubr.msk.f32.vlgmr.msra.gmra.mxu1 %vm60_vm3, %v841_v2 }
0x1108   :  { %v911_v30 = vpop.f32.mrf.mxu1 }
0x1109   :  { %v1123_v33 = vmul.f32 -1.442695, %v911_v30 }
0x110a   :  { %v913_v31 = vpop.f32.mrf.mxu1 }
0x110b   :  { %1230 = vtanh.f32 %v913_v31  ;;  %v1124_v42 = vmul.f32 -1.442695, %v913_v31 }
0x110c   :  { %1232 = vpow2.f32 %v1123_v33 }
0x1118   :  { %v1231_v32 = vpop.eup %1230 }
0x1119   :  { %931 = vrot.lane.b32.xlu1 %v1231_v32, %s1280_s25  ;;  %v1233_v34 = vpop.eup %1232 }
0x111a   :  { %v922_v35 = vadd.f32 1.0, %v1233_v34 }
0x111c   :  { %1234 = vrcp.f32 %v922_v35 }
0x1129   :  { %v1235_v36 = vpop.eup %1234 }
0x112a   :  { %v929_v38 = vmul.f32 %v1235_v36, %v830_v14 }
0x118b   :  { %v932_v3 = vpop.permute.xlu1 %931 }
0x118c   :  { %v934_v37 = vmul.f32 %v1235_v36, %v932_v3 }
0x118e   :  { %936 = vrot.lane.b32.xlu0 %v934_v37, %s1280_s25 }
0x1200   :  { %v937_v39 = vpop.permute.xlu0 %936 }
0x1201   :  { %v939_v40 = vadd.f32 %v937_v39, %v929_v38 }
0x1203   :  { %1236 = vtanh.f32 %v939_v40 }
0x1204   :  { %1238 = vpow2.f32 %v1124_v42 }
0x1210   :  { %v1237_v41 = vpop.eup %1236 }
0x1211   :  { %942 = vrot.lane.b32.xlu1 %v1237_v41, %s1280_s25  ;;  %v1239_v43 = vpop.eup %1238 }
0x1212   :  { %v923_v44 = vadd.f32 1.0, %v1239_v43 }
0x1214   :  { %1240 = vrcp.f32 %v923_v44 }
0x1221   :  { %v1241_v45 = vpop.eup %1240 }
0x1283   :  { %v943_v46 = vpop.permute.xlu1 %942 }
0x1284   :  { %v945_v47 = vmul.f32 %v1241_v45, %v943_v46 }
0x1286   :  { %v946_v48 = vsel %vm56_vm1, %v945_v47, 0.0 }
0x1287   :  { %v947_v49 = vsel %vm58_vm2, %v946_v48, 1.0 }
0x1288   :  { %1127 = vmatmul.mubr.msk.f32.vlgmr.msra.gmra.mxu0 %vm60_vm3, %v947_v49 }
0x1348   :  { %v1017_v50 = vpop.f32.mrf.mxu0 }
0x1349   :  { %v1128_v53 = vmul.f32 -1.442695, %v1017_v50 }
0x134a   :  { %v1019_v51 = vpop.f32.mrf.mxu0 }
0x134b   :  { %1242 = vtanh.f32 %v1019_v51  ;;  %v1129_v0 = vmul.f32 -1.442695, %v1019_v51 }
0x134c   :  { %1244 = vpow2.f32 %v1128_v53 }
0x1358   :  { %v1243_v52 = vpop.eup %1242 }
0x1359   :  { %1037 = vrot.lane.b32.xlu0 %v1243_v52, %s1280_s25  ;;  %v1245_v54 = vpop.eup %1244 }
0x135a   :  { %v1028_v55 = vadd.f32 1.0, %v1245_v54 }
0x135c   :  { %1246 = vrcp.f32 %v1028_v55 }
0x1369   :  { %v1247_v56 = vpop.eup %1246 }
0x136a   :  { %v1035_v60 = vmul.f32 %v1247_v56, %v939_v40 }
0x13cb   :  { %v1038_v57 = vpop.permute.xlu0 %1037 }
0x13cc   :  { %v1040_v58 = vmul.f32 %v1247_v56, %v1038_v57 }
0x13ce   :  { %1042 = vrot.lane.b32.xlu1 %v1040_v58, %s1280_s25 }
0x13d2   :  { %1058 = vrot.lane.b32.xlu1 %v1130_v59, %s1288_s7 }
0x1440   :  { %v1043_v61 = vpop.permute.xlu1 %1042 }
0x1441   :  { %v1045_v62 = vadd.f32 %v1043_v61, %v1035_v60 }
0x1443   :  { %1248 = vtanh.f32 %v1045_v62 }
0x1444   :  { %1250 = vpow2.f32 %v1129_v0  ;;  %v1059_v25 = vpop.permute.xlu1 %1058 }
0x1450   :  { %v1249_v63 = vpop.eup %1248 }
0x1451   :  { %1048 = vrot.lane.b32.xlu0 %v1249_v63, %s1280_s25  ;;  %v1251_v21 = vpop.eup %1250 }
0x1452   :  { %v1029_v22 = vadd.f32 1.0, %v1251_v21 }
0x1454   :  { %1252 = vrcp.f32 %v1029_v22 }
0x1461   :  { %v1253_v23 = vpop.eup %1252 }
0x14c3   :  { %v1049_v24 = vpop.permute.xlu0 %1048 }
0x14c4   :  { %v1051_v26 = vmul.f32 %v1253_v23, %v1049_v24 }
0x14c6   :  { %v1061_v1 = vmul.f32 %v1059_v25, %v1051_v26 }
0x14c8   :  { %1063 = vrot.lane.b32.xlu0 %v1061_v1, %s1289_s2 }
0x153a   :  { %v1064_v4 = vpop.permute.xlu0 %1063 }
0x153b   :  { %v1067_v5 = vsel %vm1066_vm5, %v1064_v4, 0.0 }
0x153c   :  { %1068 = vadd.xlane.f32.xlu1 %v1067_v5 }
0x15c5   :  { %v1069_v7 = vpop.xlane.xlu1 %1068 }
0x15c6   :  { %v1077_v8 = vadd.f32 %v1131_v6, %v1069_v7 }
0x15c8   :  { %1079 = vst.msk [vmem:[%s1626_s4] sm:$0x3] %vm1078_vm6, %v1077_v8 }
0x15c9   :  { %1084 = vsyncpa [#allocation4], 1 }

</bundles_post_ra>
